<compile_context>
chip_gen: v7x
topology: tpu7x:2x2x1
jax: 0.10.0
libtpu: 0.0.40
codegen_flags: <defaults>
</compile_context>

<pallas_src>
import functools

import jax
import jax.numpy as jnp
from jax import lax
from jax.experimental import pallas as pl
from jax.experimental.pallas import tpu as pltpu


def _attention_kernel(x_ref, xg_ref, wq_ref, wkv_ref, wproj_ref, bproj_ref,
                      out_x_ref, out_xg_ref, *, num_heads, scale):
    """Fused dual-stream multi-head self-attention for one batch tile.

    x_ref, xg_ref : (BT, N, C)  input tokens (local / global streams)
    wq_ref        : (C, C)      q projection (shared by x and xg, no bias)
    wkv_ref       : (C, 2C)     kv projection (no bias); keys/values from x
    wproj_ref     : (C, C)      output projection weight
    bproj_ref     : (1, C)      output projection bias
    out_*_ref     : (BT, N, C)
    """
    BT, N, C = x_ref.shape
    H = num_heads
    hd = C // H
    M = 2 * N                      # fused query rows per batch element (x + xg)

    x = x_ref[...]
    xg = xg_ref[...]

    # ---- Stream fusion: queries from both streams, keys/values from x only.
    xcat = jnp.concatenate([x, xg], axis=1)          # (BT, 2N, C)
    q_in = xcat.reshape(BT * M, C)                   # leading-dim merge (free)
    kv_in = x.reshape(BT * N, C)

    # ---- Fused projections; softmax scale folded into q once.
    q2d = jnp.dot(q_in, wq_ref[...],
                  preferred_element_type=jnp.float32) * scale       # (BT*M, C)
    kv2d = jnp.dot(kv_in, wkv_ref[...],
                   preferred_element_type=jnp.float32)              # (BT*N, 2C)

    # ---- Heads-leading operands (H, rows, hd) for batched matmuls.
    q_h = jnp.stack([q2d[:, h * hd:(h + 1) * hd] for h in range(H)], axis=0)
    k_h = jnp.stack([kv2d[:, h * hd:(h + 1) * hd] for h in range(H)], axis=0)
    v_h = jnp.stack([kv2d[:, C + h * hd:C + (h + 1) * hd] for h in range(H)],
                    axis=0)

    ctx_rows = []
    for b in range(BT):            # static unroll; keys never cross batch elems
        if BT == 1:
            qb, kb, vb = q_h, k_h, v_h
        else:
            qb = q_h[:, b * M:(b + 1) * M, :]        # (H, 2N, hd)
            kb = k_h[:, b * N:(b + 1) * N, :]        # (H, N, hd)
            vb = v_h[:, b * N:(b + 1) * N, :]        # (H, N, hd)

        # Scores: contract last dims of q and k, batch over heads -> (H, 2N, N).
        s = lax.dot_general(qb, kb, (((2,), (2,)), ((0,), (0,))),
                            preferred_element_type=jnp.float32)
        s = s - jnp.max(s, axis=-1, keepdims=True)
        p = jnp.exp(s)
        p = p * pl.reciprocal(jnp.sum(p, axis=-1, keepdims=True), approx=True)

        # Context: (H, 2N, hd), batched over heads (contract p's N with v's N).
        o = lax.dot_general(p, vb, (((2,), (1,)), ((0,), (0,))),
                            preferred_element_type=jnp.float32)

        # Merge heads back to token-major (2N, C) for the output projection.
        ctx_rows.append(jnp.concatenate([o[h] for h in range(H)], axis=-1))

    ctx = ctx_rows[0] if BT == 1 else jnp.concatenate(ctx_rows, axis=0)

    # ---- Single fused output projection for both streams and all batch rows.
    y = (jnp.dot(ctx, wproj_ref[...], preferred_element_type=jnp.float32)
         + bproj_ref[...])                                           # (BT*M, C)
    y = y.reshape(BT, M, C)
    out_x_ref[...] = y[:, :N, :].astype(out_x_ref.dtype)
    out_xg_ref[...] = y[:, N:, :].astype(out_xg_ref.dtype)


def _pick_block_b(batch):
    """Largest batch tile <= 4 that divides B while keeping >= 2 grid steps
    (so both v7x TensorCores are used)."""
    for cand in (4, 2):
        if batch % cand == 0 and batch // cand >= 2:
            return cand
    return 1


def attention_forward(x, xg, params, *, num_heads, block_b=None):
    """x, xg: (B, N, C).  Returns (x_out, xg_out), each (B, N, C)."""
    B, N, C = x.shape
    assert C % num_heads == 0
    scale = (C // num_heads) ** (-0.5)

    if block_b is None:
        block_b = _pick_block_b(B)
    assert B % block_b == 0, (B, block_b)
    grid_b = B // block_b

    wq, wkv, wproj, bproj = (params["wq"], params["wkv"],
                             params["wproj"], params["bproj"])
    bproj2d = bproj.reshape(1, C)

    kernel = functools.partial(_attention_kernel,
                               num_heads=num_heads, scale=scale)

    # Token blocks: tile only the batch dim; (N, C) equal the full array dims
    # so the (8,128) constraint is satisfied at any N, C.
    tok_spec = pl.BlockSpec((block_b, N, C), lambda b: (b, 0, 0))
    # Weights stay VMEM-resident across the grid (constant index_map).
    wq_spec = pl.BlockSpec((C, C), lambda b: (0, 0))
    wkv_spec = pl.BlockSpec((C, 2 * C), lambda b: (0, 0))
    wproj_spec = pl.BlockSpec((C, C), lambda b: (0, 0))
    bproj_spec = pl.BlockSpec((1, C), lambda b: (0, 0))

    out_x, out_xg = pl.pallas_call(
        kernel,
        out_shape=(jax.ShapeDtypeStruct((B, N, C), x.dtype),
                   jax.ShapeDtypeStruct((B, N, C), xg.dtype)),
        grid_spec=pltpu.PrefetchScalarGridSpec(
            num_scalar_prefetch=0,
            grid=(grid_b,),
            in_specs=[tok_spec, tok_spec, wq_spec, wkv_spec,
                      wproj_spec, bproj_spec],
            out_specs=(tok_spec, tok_spec),
        ),
        compiler_params=pltpu.CompilerParams(
            dimension_semantics=("parallel",)),
    )(x, xg, wq, wkv, wproj, bproj2d)
    return out_x, out_xg


def attention_reference(x, xg, params, *, num_heads):
    """Pure-JAX reference mirroring the PyTorch forward (sr_ratio=1)."""
    B, N, C = x.shape
    hd = C // num_heads
    scale = hd ** (-0.5)
    wq, wkv, wproj, bproj = (params["wq"], params["wkv"],
                             params["wproj"], params["bproj"])

    def proj_heads(t, w):
        y = t @ w                                   # (B, N, C)
        return y.reshape(B, N, num_heads, hd).transpose(0, 2, 1, 3)

    q = proj_heads(x, wq)                           # (B, h, N, hd)
    qg = proj_heads(xg, wq)
    kvo = x @ wkv                                   # (B, N, 2C)
    kvo = kvo.reshape(B, N, 2, num_heads, hd).transpose(2, 0, 3, 1, 4)
    k, v = kvo[0], kvo[1]                           # (B, h, N, hd)

    def run(qm):
        attn = jnp.einsum("bhnd,bhmd->bhnm", qm, k) * scale
        attn = jax.nn.softmax(attn, axis=-1)
        o = jnp.einsum("bhnm,bhmd->bhnd", attn, v)
        o = o.transpose(0, 2, 1, 3).reshape(B, N, C)
        return o @ wproj + bproj

    return run(q), run(qg)


def init_params(key, dim):
    """Deterministic synthetic parameters (trunc_normal std=0.02 ~ normal)."""
    k1, k2, k3, _ = jax.random.split(key, 4)
    std = 0.02
    return {
        "wq": jax.random.normal(k1, (dim, dim), jnp.float32) * std,
        "wkv": jax.random.normal(k2, (dim, 2 * dim), jnp.float32) * std,
        "wproj": jax.random.normal(k3, (dim, dim), jnp.float32) * std,
        "bproj": jnp.zeros((dim,), jnp.float32),
    }


if __name__ == "__main__":
    # Small shapes consistent with the module: B=2, H=W=4 -> N=16, C=32, heads=4.
    B, Himg, Wimg, C = 2, 4, 4, 32
    N = Himg * Wimg
    num_heads = 4

    key = jax.random.PRNGKey(0)
    kx, kxg, kp = jax.random.split(key, 3)
    x = jax.random.normal(kx, (B, N, C), jnp.float32)
    xg = jax.random.normal(kxg, (B, N, C), jnp.float32)
    params = init_params(kp, C)

    out_x, out_xg = attention_forward(x, xg, params, num_heads=num_heads)
    out_x, out_xg = jax.block_until_ready((out_x, out_xg))

    ref_x, ref_xg = attention_reference(x, xg, params, num_heads=num_heads)
    assert out_x.shape == (B, N, C) and out_xg.shape == (B, N, C)
    # Tolerance accounts for the EUP approximate reciprocal in the softmax.
    assert jnp.allclose(out_x, ref_x, atol=1e-3, rtol=1e-2)
    assert jnp.allclose(out_xg, ref_xg, atol=1e-3, rtol=1e-2)

    print("KERNEL_OK")
</pallas_src>

<mosaic_0001>
module attributes {stable_mosaic.version = 11 : i64} {
  func.func @_attention_kernel(%arg0: i32, %arg1: memref<1x16x32xf32, #tpu.memory_space<vmem>>, %arg2: memref<1x16x32xf32, #tpu.memory_space<vmem>>, %arg3: memref<32x32xf32, #tpu.memory_space<vmem>>, %arg4: memref<32x64xf32, #tpu.memory_space<vmem>>, %arg5: memref<32x32xf32, #tpu.memory_space<vmem>>, %arg6: memref<1x32xf32, #tpu.memory_space<vmem>>, %arg7: memref<1x16x32xf32, #tpu.memory_space<vmem>>, %arg8: memref<1x16x32xf32, #tpu.memory_space<vmem>>) attributes {dimension_semantics = [#tpu.dimension_semantics<parallel>], iteration_bounds = array<i64: 2>, scalar_prefetch = 0 : i64, scratch_operands = 0 : i64, tpu.core_type = #tpu.core_type<tc>, window_params = [{transform_indices = @transform_0, window_bounds = array<i64: 1, 16, 32>}, {transform_indices = @transform_1, window_bounds = array<i64: 1, 16, 32>}, {pipeline_mode = #tpu.pipeline_mode<synchronous>, transform_indices = @transform_2, window_bounds = array<i64: 32, 32>}, {pipeline_mode = #tpu.pipeline_mode<synchronous>, transform_indices = @transform_3, window_bounds = array<i64: 32, 64>}, {pipeline_mode = #tpu.pipeline_mode<synchronous>, transform_indices = @transform_4, window_bounds = array<i64: 32, 32>}, {pipeline_mode = #tpu.pipeline_mode<synchronous>, transform_indices = @transform_5, window_bounds = array<i64: 1, 32>}, {transform_indices = @transform_6, window_bounds = array<i64: 1, 16, 32>}, {transform_indices = @transform_7, window_bounds = array<i64: 1, 16, 32>}]} {
    %c0 = arith.constant 0 : index
    %c0_0 = arith.constant 0 : index
    %c0_1 = arith.constant 0 : index
    %0 = vector.load %arg1[%c0, %c0_0, %c0_1] : memref<1x16x32xf32, #tpu.memory_space<vmem>>, vector<1x16x32xf32>
    %c0_2 = arith.constant 0 : index
    %c0_3 = arith.constant 0 : index
    %c0_4 = arith.constant 0 : index
    %1 = vector.load %arg2[%c0_2, %c0_3, %c0_4] : memref<1x16x32xf32, #tpu.memory_space<vmem>>, vector<1x16x32xf32>
    %2 = tpu.concatenate %0, %1 in 1 : vector<1x16x32xf32>, vector<1x16x32xf32> -> vector<1x32x32xf32>
    %3 = vector.shape_cast %2 : vector<1x32x32xf32> to vector<32x32xf32>
    %4 = vector.shape_cast %0 : vector<1x16x32xf32> to vector<16x32xf32>
    %c0_5 = arith.constant 0 : index
    %c0_6 = arith.constant 0 : index
    %5 = vector.load %arg3[%c0_5, %c0_6] : memref<32x32xf32, #tpu.memory_space<vmem>>, vector<32x32xf32>
    %cst = arith.constant dense<0.000000e+00> : vector<32x32xf32>
    %6 = tpu.matmul %3, %5, %cst {dimension_numbers = #tpu.dot_dimension_numbers<[1], [0], [0], [1], [0, 0, 1, 1], [], []>} : vector<32x32xf32>, vector<32x32xf32>, vector<32x32xf32> -> vector<32x32xf32>
    %cst_7 = arith.constant 0.353553385 : f32
    %7 = vector.broadcast %cst_7 : f32 to vector<32x32xf32>
    %8 = arith.mulf %6, %7 : vector<32x32xf32>
    %c0_8 = arith.constant 0 : index
    %c0_9 = arith.constant 0 : index
    %9 = vector.load %arg4[%c0_8, %c0_9] : memref<32x64xf32, #tpu.memory_space<vmem>>, vector<32x64xf32>
    %cst_10 = arith.constant dense<0.000000e+00> : vector<16x64xf32>
    %10 = tpu.matmul %4, %9, %cst_10 {dimension_numbers = #tpu.dot_dimension_numbers<[1], [0], [0], [1], [0, 0, 1, 1], [], []>} : vector<16x32xf32>, vector<32x64xf32>, vector<16x64xf32> -> vector<16x64xf32>
    %11 = vector.extract_strided_slice %8 {offsets = [0, 0], sizes = [32, 8], strides = [1, 1]} : vector<32x32xf32> to vector<32x8xf32>
    %12 = vector.extract_strided_slice %8 {offsets = [0, 8], sizes = [32, 8], strides = [1, 1]} : vector<32x32xf32> to vector<32x8xf32>
    %13 = vector.extract_strided_slice %8 {offsets = [0, 16], sizes = [32, 8], strides = [1, 1]} : vector<32x32xf32> to vector<32x8xf32>
    %14 = vector.extract_strided_slice %8 {offsets = [0, 24], sizes = [32, 8], strides = [1, 1]} : vector<32x32xf32> to vector<32x8xf32>
    %15 = vector.shape_cast %11 : vector<32x8xf32> to vector<1x32x8xf32>
    %16 = vector.shape_cast %12 : vector<32x8xf32> to vector<1x32x8xf32>
    %17 = vector.shape_cast %13 : vector<32x8xf32> to vector<1x32x8xf32>
    %18 = vector.shape_cast %14 : vector<32x8xf32> to vector<1x32x8xf32>
    %19 = tpu.concatenate %15, %16, %17, %18 in 0 : vector<1x32x8xf32>, vector<1x32x8xf32>, vector<1x32x8xf32>, vector<1x32x8xf32> -> vector<4x32x8xf32>
    %20 = vector.extract_strided_slice %10 {offsets = [0, 0], sizes = [16, 8], strides = [1, 1]} : vector<16x64xf32> to vector<16x8xf32>
    %21 = vector.extract_strided_slice %10 {offsets = [0, 8], sizes = [16, 8], strides = [1, 1]} : vector<16x64xf32> to vector<16x8xf32>
    %22 = vector.extract_strided_slice %10 {offsets = [0, 16], sizes = [16, 8], strides = [1, 1]} : vector<16x64xf32> to vector<16x8xf32>
    %23 = vector.extract_strided_slice %10 {offsets = [0, 24], sizes = [16, 8], strides = [1, 1]} : vector<16x64xf32> to vector<16x8xf32>
    %24 = vector.shape_cast %20 : vector<16x8xf32> to vector<1x16x8xf32>
    %25 = vector.shape_cast %21 : vector<16x8xf32> to vector<1x16x8xf32>
    %26 = vector.shape_cast %22 : vector<16x8xf32> to vector<1x16x8xf32>
    %27 = vector.shape_cast %23 : vector<16x8xf32> to vector<1x16x8xf32>
    %28 = tpu.concatenate %24, %25, %26, %27 in 0 : vector<1x16x8xf32>, vector<1x16x8xf32>, vector<1x16x8xf32>, vector<1x16x8xf32> -> vector<4x16x8xf32>
    %29 = vector.extract_strided_slice %10 {offsets = [0, 32], sizes = [16, 8], strides = [1, 1]} : vector<16x64xf32> to vector<16x8xf32>
    %30 = vector.extract_strided_slice %10 {offsets = [0, 40], sizes = [16, 8], strides = [1, 1]} : vector<16x64xf32> to vector<16x8xf32>
    %31 = vector.extract_strided_slice %10 {offsets = [0, 48], sizes = [16, 8], strides = [1, 1]} : vector<16x64xf32> to vector<16x8xf32>
    %32 = vector.extract_strided_slice %10 {offsets = [0, 56], sizes = [16, 8], strides = [1, 1]} : vector<16x64xf32> to vector<16x8xf32>
    %33 = vector.shape_cast %29 : vector<16x8xf32> to vector<1x16x8xf32>
    %34 = vector.shape_cast %30 : vector<16x8xf32> to vector<1x16x8xf32>
    %35 = vector.shape_cast %31 : vector<16x8xf32> to vector<1x16x8xf32>
    %36 = vector.shape_cast %32 : vector<16x8xf32> to vector<1x16x8xf32>
    %37 = tpu.concatenate %33, %34, %35, %36 in 0 : vector<1x16x8xf32>, vector<1x16x8xf32>, vector<1x16x8xf32>, vector<1x16x8xf32> -> vector<4x16x8xf32>
    %cst_11 = arith.constant dense<0.000000e+00> : vector<4x32x16xf32>
    %38 = tpu.matmul %19, %28, %cst_11 {dimension_numbers = #tpu.dot_dimension_numbers<[2], [2], [1], [1], [0, 0, 0, 1, 1, 1], [0], [0]>} : vector<4x32x8xf32>, vector<4x16x8xf32>, vector<4x32x16xf32> -> vector<4x32x16xf32>
    %cst_12 = arith.constant dense<0xFF800000> : vector<4x32xf32>
    %39 = vector.multi_reduction <maximumf>, %38, %cst_12 [2] : vector<4x32x16xf32> to vector<4x32xf32>
    %40 = vector.shape_cast %39 : vector<4x32xf32> to vector<4x32x1xf32>
    %41 = vector.broadcast %40 : vector<4x32x1xf32> to vector<4x32x16xf32>
    %42 = arith.subf %38, %41 : vector<4x32x16xf32>
    %43 = math.exp %42 : vector<4x32x16xf32>
    %cst_13 = arith.constant dense<0.000000e+00> : vector<4x32xf32>
    %44 = vector.multi_reduction <add>, %43, %cst_13 [2] : vector<4x32x16xf32> to vector<4x32xf32>
    %45 = vector.shape_cast %44 : vector<4x32xf32> to vector<4x32x1xf32>
    %46 = tpu.reciprocal %45 {approx = true} : vector<4x32x1xf32> -> vector<4x32x1xf32>
    %47 = vector.broadcast %46 : vector<4x32x1xf32> to vector<4x32x16xf32>
    %48 = arith.mulf %43, %47 : vector<4x32x16xf32>
    %cst_14 = arith.constant dense<0.000000e+00> : vector<4x32x8xf32>
    %49 = tpu.matmul %48, %37, %cst_14 {dimension_numbers = #tpu.dot_dimension_numbers<[2], [1], [1], [2], [0, 0, 0, 1, 1, 2], [0], [0]>} : vector<4x32x16xf32>, vector<4x16x8xf32>, vector<4x32x8xf32> -> vector<4x32x8xf32>
    %50 = vector.extract_strided_slice %49 {offsets = [0, 0, 0], sizes = [1, 32, 8], strides = [1, 1, 1]} : vector<4x32x8xf32> to vector<1x32x8xf32>
    %51 = vector.shape_cast %50 : vector<1x32x8xf32> to vector<32x8xf32>
    %52 = vector.extract_strided_slice %49 {offsets = [1, 0, 0], sizes = [1, 32, 8], strides = [1, 1, 1]} : vector<4x32x8xf32> to vector<1x32x8xf32>
    %53 = vector.shape_cast %52 : vector<1x32x8xf32> to vector<32x8xf32>
    %54 = vector.extract_strided_slice %49 {offsets = [2, 0, 0], sizes = [1, 32, 8], strides = [1, 1, 1]} : vector<4x32x8xf32> to vector<1x32x8xf32>
    %55 = vector.shape_cast %54 : vector<1x32x8xf32> to vector<32x8xf32>
    %56 = vector.extract_strided_slice %49 {offsets = [3, 0, 0], sizes = [1, 32, 8], strides = [1, 1, 1]} : vector<4x32x8xf32> to vector<1x32x8xf32>
    %57 = vector.shape_cast %56 : vector<1x32x8xf32> to vector<32x8xf32>
    %58 = tpu.concatenate %51, %53, %55, %57 in 1 : vector<32x8xf32>, vector<32x8xf32>, vector<32x8xf32>, vector<32x8xf32> -> vector<32x32xf32>
    %c0_15 = arith.constant 0 : index
    %c0_16 = arith.constant 0 : index
    %59 = vector.load %arg5[%c0_15, %c0_16] : memref<32x32xf32, #tpu.memory_space<vmem>>, vector<32x32xf32>
    %cst_17 = arith.constant dense<0.000000e+00> : vector<32x32xf32>
    %60 = tpu.matmul %58, %59, %cst_17 {dimension_numbers = #tpu.dot_dimension_numbers<[1], [0], [0], [1], [0, 0, 1, 1], [], []>} : vector<32x32xf32>, vector<32x32xf32>, vector<32x32xf32> -> vector<32x32xf32>
    %c0_18 = arith.constant 0 : index
    %c0_19 = arith.constant 0 : index
    %61 = vector.load %arg6[%c0_18, %c0_19] : memref<1x32xf32, #tpu.memory_space<vmem>>, vector<1x32xf32>
    %62 = vector.broadcast %61 : vector<1x32xf32> to vector<32x32xf32>
    %63 = arith.addf %60, %62 : vector<32x32xf32>
    %64 = vector.shape_cast %63 : vector<32x32xf32> to vector<1x32x32xf32>
    %65 = vector.extract_strided_slice %64 {offsets = [0, 0, 0], sizes = [1, 16, 32], strides = [1, 1, 1]} : vector<1x32x32xf32> to vector<1x16x32xf32>
    %c0_20 = arith.constant 0 : index
    %c0_21 = arith.constant 0 : index
    %c0_22 = arith.constant 0 : index
    %66 = vector.load %arg7[%c0_20, %c0_21, %c0_22] : memref<1x16x32xf32, #tpu.memory_space<vmem>>, vector<1x16x32xf32>
    tpu.vector_store %arg7[%c0_20, %c0_21, %c0_22], %65 {strides = array<i32>} : memref<1x16x32xf32, #tpu.memory_space<vmem>>, vector<1x16x32xf32>,
    %67 = vector.extract_strided_slice %64 {offsets = [0, 16, 0], sizes = [1, 16, 32], strides = [1, 1, 1]} : vector<1x32x32xf32> to vector<1x16x32xf32>
    %c0_23 = arith.constant 0 : index
    %c0_24 = arith.constant 0 : index
    %c0_25 = arith.constant 0 : index
    %68 = vector.load %arg8[%c0_23, %c0_24, %c0_25] : memref<1x16x32xf32, #tpu.memory_space<vmem>>, vector<1x16x32xf32>
    tpu.vector_store %arg8[%c0_23, %c0_24, %c0_25], %67 {strides = array<i32>} : memref<1x16x32xf32, #tpu.memory_space<vmem>>, vector<1x16x32xf32>,
    return
  }
  func.func @transform_0(%arg0: i32) -> (i32, i32, i32) {
    %c0_i32 = arith.constant 0 : i32
    %c0_i32_0 = arith.constant 0 : i32
    %c0_i32_1 = arith.constant 0 : i32
    return %arg0, %c0_i32, %c0_i32_0 : i32, i32, i32
  }
  func.func @transform_1(%arg0: i32) -> (i32, i32, i32) {
    %c0_i32 = arith.constant 0 : i32
    %c0_i32_0 = arith.constant 0 : i32
    %c0_i32_1 = arith.constant 0 : i32
    return %arg0, %c0_i32, %c0_i32_0 : i32, i32, i32
  }
  func.func @transform_2(%arg0: i32) -> (i32, i32) {
    %c0_i32 = arith.constant 0 : i32
    %c0_i32_0 = arith.constant 0 : i32
    %c0_i32_1 = arith.constant 0 : i32
    return %c0_i32, %c0_i32_0 : i32, i32
  }
  func.func @transform_3(%arg0: i32) -> (i32, i32) {
    %c0_i32 = arith.constant 0 : i32
    %c0_i32_0 = arith.constant 0 : i32
    %c0_i32_1 = arith.constant 0 : i32
    return %c0_i32, %c0_i32_0 : i32, i32
  }
  func.func @transform_4(%arg0: i32) -> (i32, i32) {
    %c0_i32 = arith.constant 0 : i32
    %c0_i32_0 = arith.constant 0 : i32
    %c0_i32_1 = arith.constant 0 : i32
    return %c0_i32, %c0_i32_0 : i32, i32
  }
  func.func @transform_5(%arg0: i32) -> (i32, i32) {
    %c0_i32 = arith.constant 0 : i32
    %c0_i32_0 = arith.constant 0 : i32
    %c0_i32_1 = arith.constant 0 : i32
    return %c0_i32, %c0_i32_0 : i32, i32
  }
  func.func @transform_6(%arg0: i32) -> (i32, i32, i32) {
    %c0_i32 = arith.constant 0 : i32
    %c0_i32_0 = arith.constant 0 : i32
    %c0_i32_1 = arith.constant 0 : i32
    return %arg0, %c0_i32, %c0_i32_0 : i32, i32, i32
  }
  func.func @transform_7(%arg0: i32) -> (i32, i32, i32) {
    %c0_i32 = arith.constant 0 : i32
    %c0_i32_0 = arith.constant 0 : i32
    %c0_i32_1 = arith.constant 0 : i32
    return %arg0, %c0_i32, %c0_i32_0 : i32, i32, i32
  }
}

</mosaic_0001>

<bundles_post_ra>
// kernel: tpu_custom_call.1
= control target key start
LH: loop header
LB: loop body
LE: loop exit
PB: predicated region body
PF: predicated region fallthrough
CT: control target
= control target key end

     0   :  { %s3444_s0 = inlined_call_operand.hbm [shape: f32[2,16,32], index: 0, kind: input, shape index: {}]   ;;  %s3445_s1 = inlined_call_operand.hbm [shape: f32[2,16,32], index: 1, kind: input, shape index: {}]   ;;  %s3446_s2 = inlined_call_operand.hbm [shape: f32[32,32], index: 2, kind: input, shape index: {}]   ;;  %s3447_s3 = inlined_call_operand.hbm [shape: f32[32,64], index: 3, kind: input, shape index: {}]   ;;  %s3448_s4 = inlined_call_operand.hbm [shape: f32[32,32], index: 4, kind: input, shape index: {}]   ;;  %s3449_s5 = inlined_call_operand.vmem [shape: f32[1,32], index: 5, kind: input, shape index: {}]   ;;  %s3450_s6 = inlined_call_operand.hbm [shape: f32[2,16,32], index: 6, kind: output, shape index: {0}]   ;;  %s3451_s7 = inlined_call_operand.hbm [shape: f32[2,16,32], index: 7, kind: output, shape index: {1}]  }
   0x1   :  { %3460 = sst [smem:[#allocation22_spill]] %s3444_s0 }
   0x2   :  { %3461 = sst [smem:[#allocation23_spill]] %s3446_s2 }
   0x3   :  { %3462 = sst [smem:[#allocation24_spill]] %s3447_s3 }
   0x4   :  { %3463 = sst [smem:[#allocation25_spill]] %s3448_s4 }
   0x5   :  { %13 = vsyncpa [#allocation3], 0 }
   0x6   :  { %15 = vsyncpa [#allocation3 + $0x1], 0 }
   0x7   :  { %16 = vsyncpa [#allocation6], 0 }
   0x8   :  { %18 = vsyncpa [#allocation6 + $0x1], 0 }
   0x9   :  { %19 = vsyncpa [#allocation9], 0 }
   0xa   :  { %20 = vsyncpa [#allocation4], 0 }
   0xb   :  { %22 = vsyncpa [#allocation4 + $0x1], 0 }
   0xc   :  { %23 = vsyncpa [#allocation13], 0 }
   0xd   :  { %25 = vsyncpa [#allocation13 + $0x1], 0  ;;  %s2811_s24 = smov 0   ;;  %s2813_s25 = smov 0  }
   0xe   :  { %s2815_s26 = smov 0   ;;  %s2817_s27 = smov 0  }
   0xf LB: > { %s2832_s28 = sadd.s32 4294967295, %s2752_s27   ;;  %s1964_s29 = sadd.s32 4294967294, %s2752_s27   ;;  %s2752_s27 = sphi %s2817_s27, %s3495_s27   ;;  %s2748_s26 = sphi %s2815_s26, %s3494_s26   ;;  %s2744_s25 = sphi %s2813_s25, %s3493_s25   ;;  %s2740_s24 = sphi %s2811_s24, %s3492_s24  }
  0x10   : > { %p51_p0 = scmp.ne.s32.totalorder %s2744_s25, %s2740_s24  ;;  %p3452_p1 = scmp.eq.s32.totalorder %s2832_s28, 0 }
  0x11   : > { %p191_p3 = scmp.eq.s32.totalorder %s1964_s29, 1  ;;  %p1965_p5 = scmp.ge.s32.totalorder %s2752_s27, 1 }
  0x12   : > { %p2841_p4 = por %p3452_p1, %p51_p0  ;;  %p224_p7 = scmp.lt.s32.totalorder %s2752_s27, 3 }
  0x13   : > { %p2846_p6 = por %p191_p3, %p51_p0  ;;  %s2754_s10 = smov [#allocation7]  }
  0x14   : > { %s3464_s30 = scalar_select %p2841_p4, 1, 0 }
  0x15   : > { %s3465_s8 = scalar_select %p2846_p6, 1, 0 }
  0x16   : > { %p2851_p8 = pnand %p1965_p5, %p224_p7  ;;  %s236_s11 = sshll.u32 %s2754_s10, 4  ;;  %s2855_s11 = int_to_ptr.vmem [resolvable:$true] %s236_s11 }
  0x17   : > { %3466 = sst [smem:[#allocation20_spill]] %s3465_s8  ;;  %s2755_s13 = smov [#allocation8]  }
  0x18   : > { %s3467_s9 = scalar_select %p2851_p8, 1, 0 }
  0x19   : > { %p2322_p9 = pneg %p2851_p8  ;;  %s249_s14 = sshll.u32 %s2755_s13, 4  ;;  %s2866_s14 = int_to_ptr.vmem [resolvable:$true] %s249_s14 }
  0x1a   : > { %s2756_s15 = smov [#allocation10]   ;;  %s3469_s2 = sld [smem:[#allocation23_spill]] }
  0x1b   : > { %p2862_p11 = pnand %p2322_p9, %p3452_p1  ;;  %s2868_s16 = sshll.u32 %s2756_s15, 4  ;;  %s263_s16 = int_to_ptr.vmem [resolvable:$true] %s2868_s16 }
  0x1d   : > { %p2878_p13 = pneg %p2862_p11 }
  0x20   : > { %s2498_s19 = scalar_lea.hbm %s3469_s2, 512 }
  0x21   : > { %p2499_p12 = scmp.ne.s32.totalorder %s3469_s2, %s2498_s19  ;;  %p2505_p5 = scmp.lt.u32.totalorder %s2498_s19, %s3469_s2 }
  0x23   : > { %p2501_p0 = pnand %p2878_p13, %p2499_p12 }
  0x25   : > { %p2502_p3 = pneg %p2501_p0 }
  0x27   : > { %p2507_p7 = pnand %p2505_p5, %p2502_p3 }
  0x29   : > { %2510 = shalt.err (!%p2507_p7)
}
  0x2a   : > { %s2511_s10 = scalar_lea.vmem %s2855_s11, 512  ;;  %p2519_p2 = scmp.lt.s32.totalorder %s2855_s11, %s2855_s11 }
  0x2b   : > { %p2512_p9 = scmp.ne.s32.totalorder %s2855_s11, %s2511_s10  ;;  %p2520_p6 = scmp.lt.s32.totalorder %s2511_s10, %s2511_s10 }
  0x2d   : > { %p2514_p10 = pnand %p2512_p9, %p2878_p13  ;;  %p2521_p12 = por %p2520_p6, %p2519_p2 }
  0x2f   : > { %p2515_p1 = pneg %p2514_p10 }
  0x31   : > { %p2522_p0 = pnand %p2521_p12, %p2515_p1 }
  0x33   : > { %2525 = shalt.err (!%p2522_p0)
}
  0x34   : > { %s3456_s13 = smov 128   ;;  %s3458_s15 = smov 8  }
  0x35   : > { %2325 = dma.hbm_to_vmem [thread:$0]  (!%p2862_p11), %s3469_s2, 512, %s2855_s11, [#allocation6], %s3456_s13, %s3456_s13, %s3458_s15  }
  0x36   : > { %s3471_s3 = sld [smem:[#allocation24_spill]] }
  0x3c   : > { %s2526_s21 = scalar_lea.hbm %s3471_s3, 512 }
  0x3d   : > { %p2527_p1 = scmp.ne.s32.totalorder %s3471_s3, %s2526_s21  ;;  %p2533_p10 = scmp.lt.u32.totalorder %s2526_s21, %s3471_s3 }
  0x3f   : > { %p2529_p2 = pnand %p2527_p1, %p2878_p13 }
  0x41   : > { %p2530_p6 = pneg %p2529_p2 }
  0x43   : > { %p2535_p3 = pnand %p2533_p10, %p2530_p6 }
  0x45   : > { %2538 = shalt.err (!%p2535_p3)
}
  0x46   : > { %s2539_s11 = scalar_lea.vmem %s2866_s14, 512  ;;  %p2547_p12 = scmp.lt.s32.totalorder %s2866_s14, %s2866_s14 }
  0x47   : > { %p2540_p5 = scmp.ne.s32.totalorder %s2866_s14, %s2539_s11  ;;  %p2548_p0 = scmp.lt.s32.totalorder %s2539_s11, %s2539_s11 }
  0x49   : > { %p2542_p7 = pnand %p2540_p5, %p2878_p13  ;;  %p2549_p1 = por %p2548_p0, %p2547_p12 }
  0x4b   : > { %p2543_p9 = pneg %p2542_p7 }
  0x4d   : > { %p2550_p2 = pnand %p2549_p1, %p2543_p9 }
  0x4f   : > { %2553 = shalt.err (!%p2550_p2)
}
  0x50   : > { %2328 = dma.hbm_to_vmem [thread:$0]  (!%p2862_p11), %s3471_s3, 512, %s2866_s14, [#allocation9], %s3456_s13, %s3456_s13, %s3458_s15  }
  0x51   : > { %s3472_s4 = sld [smem:[#allocation25_spill]] }
  0x57   : > { %s2554_s20 = scalar_lea.hbm %s3472_s4, 512 }
  0x58   : > { %p2555_p6 = scmp.ne.s32.totalorder %s3472_s4, %s2554_s20  ;;  %p2561_p5 = scmp.lt.u32.totalorder %s2554_s20, %s3472_s4 }
  0x5a   : > { %p2557_p10 = pnand %p2555_p6, %p2878_p13 }
  0x5c   : > { %p2558_p3 = pneg %p2557_p10 }
  0x5e   : > { %p2563_p7 = pnand %p2561_p5, %p2558_p3 }
  0x60   : > { %2566 = shalt.err (!%p2563_p7)
}
  0x61   : > { %s2567_s11 = scalar_lea.vmem %s263_s16, 512  ;;  %p2575_p1 = scmp.lt.s32.totalorder %s263_s16, %s263_s16 }
  0x62   : > { %p2568_p9 = scmp.ne.s32.totalorder %s263_s16, %s2567_s11  ;;  %p2576_p2 = scmp.lt.s32.totalorder %s2567_s11, %s2567_s11 }
  0x64   : > { %p2570_p12 = pnand %p2568_p9, %p2878_p13  ;;  %p2577_p4 = por %p2576_p2, %p2575_p1 }
  0x66   : > { %p2571_p0 = pneg %p2570_p12 }
  0x68   : > { %p2578_p8 = pnand %p2577_p4, %p2571_p0 }
  0x6a   : > { %2581 = shalt.err (!%p2578_p8)
}
  0x6b   : > { %2331 = dma.hbm_to_vmem [thread:$0]  (!%p2862_p11), %s3472_s4, 512, %s263_s16, [#allocation9], %s3456_s13, %s3456_s13, %s3458_s15  }
  0x6c   : > { %s2951_s22 = sadd.s32 1, %s2752_s27   ;;  %s38_s17 = sadd.s32 1, %s2748_s26 }
  0x6d   : > { %s35_s12 = ssub.s32 %s2752_s27, %s2951_s22  ;;  %p45_p8 = scmp.ne.s32.totalorder %s2748_s26, %s2744_s25 }
  0x6e   : > { %p36_p4 = scmp.eq.s32.totalorder %s35_s12, 0  ;;  %p46_p13 = scmp.eq.s32.totalorder %s2752_s27, 0 }
  0x6f   : > { %p2349_p6 = scmp.lt.s32.totalorder %s2752_s27, 2  ;;  %p3474_p3 = scmp.eq.s32.totalorder %s2832_s28, 1 }
  0x70   : > { %s2961_s18 = scalar_select %p36_p4, %s2748_s26, %s38_s17  }
  0x71   : > { %p47_p10 = por %p46_p13, %p45_p8  ;;  %p2965_p5 = por %p3474_p3, %p45_p8 }
  0x72   : > { %3473 = sst [smem:[#allocation21_spill]] %s2961_s18  ;;  %s279_s20 = sand.u32 1, %s2748_s26  }
  0x73   : > { %s2043_s21 = sshll.u32 %s2752_s27, 8  ;;  %s2971_s16 = sshll.u32 %s279_s20, 4 }
  0x74   : > { %s3476_s0 = sld [smem:[#allocation22_spill]]  ;;  %s283_s11 = scalar_lea.vmem [#allocation2], %s2971_s16 }
  0x75   : > { %s290_s14 = sshll.u32 %s283_s11, 4  ;;  %p2979_p11 = pnand %p2349_p6, %p47_p10  ;;  %s2983_s14 = int_to_ptr.vmem [resolvable:$true] %s290_s14 }
  0x76   : > { %s2988_s23 = scalar_lea.hbm %s3445_s1, %s2043_s21  ;;  %s2990_s29 = scalar_lea.sflag [#allocation3], %s279_s20 }
  0x77   : > { %p2584_p9 = pneg %p2979_p11 }
  0x7a   : > { %s2976_s10 = scalar_lea.hbm %s3476_s0, %s2043_s21  ;;  %s2587_s2 = scalar_lea.hbm %s3476_s0, 512 }
  0x7b   : > { %s2582_s13 = scalar_lea.hbm %s2976_s10, 256  ;;  %p2588_p1 = scmp.lt.u32.totalorder %s2976_s10, %s3476_s0 }
  0x7c   : > { %p2583_p7 = scmp.ne.s32.totalorder %s2976_s10, %s2582_s13  ;;  %p2589_p2 = scmp.lt.u32.totalorder %s2587_s2, %s2582_s13 }
  0x7d   : > { %p2591_p8 = scmp.lt.u32.totalorder %s2582_s13, %s2976_s10 }
  0x7e   : > { %p2585_p12 = pnand %p2584_p9, %p2583_p7  ;;  %p2590_p4 = por %p2589_p2, %p2588_p1 }
  0x80   : > { %p2586_p0 = pneg %p2585_p12  ;;  %p2592_p13 = por %p2591_p8, %p2590_p4 }
  0x82   : > { %p2593_p6 = pnand %p2592_p13, %p2586_p0 }
  0x84   : > { %2596 = shalt.err (!%p2593_p6)
}
  0x85   : > { %s2597_s20 = scalar_lea.vmem %s2983_s14, 256  ;;  %s2759_s15 = smov [#allocation2]  }
  0x86   : > { %p2598_p10 = scmp.ne.s32.totalorder %s2983_s14, %s2597_s20  ;;  %s2602_s21 = sshll.u32 %s2759_s15, 4  ;;  %s2603_s21 = int_to_ptr.vmem [resolvable:$false] %s2602_s21 }
  0x87   : > { %s2604_s3 = scalar_lea.vmem %s2603_s21, 512  ;;  %p2605_p12 = scmp.lt.s32.totalorder %s2983_s14, %s2603_s21 }
  0x88   : > { %p2600_p3 = pnand %p2598_p10, %p2584_p9  ;;  %p2606_p1 = scmp.lt.s32.totalorder %s2604_s3, %s2597_s20 }
  0x8a   : > { %p2601_p7 = pneg %p2600_p3  ;;  %p2607_p2 = por %p2606_p1, %p2605_p12 }
  0x8c   : > { %p2608_p4 = pnand %p2607_p2, %p2601_p7 }
  0x8e   : > { %2611 = shalt.err (!%p2608_p4)
}
  0x8f   : > { %s3478_s2 = smov 8   ;;  %s3479_s4 = smov 128  }
  0x90   : > { %2335 = dma.hbm_to_vmem [thread:$0]  (!%p2979_p11), %s2976_s10, 256, %s2983_s14, %s2990_s29, %s3479_s4, %s3479_s4, %s3478_s2  }
  0x91   : > { %s304_s13 = scalar_lea.vmem [#allocation5], %s2971_s16  ;;  %s300_s17 = sand.u32 1, %s2752_s27  }
  0x92   : > { %s311_s12 = sshll.u32 %s304_s13, 4  ;;  %s3025_s11 = scalar_lea.sflag [#allocation6], %s300_s17  ;;  %s3023_s12 = int_to_ptr.vmem [resolvable:$true] %s311_s12 }
  0x93   : > { %s2612_s20 = scalar_lea.hbm %s2988_s23, 256  ;;  %s2617_s3 = scalar_lea.hbm %s3445_s1, 512 }
  0x94   : > { %p2613_p0 = scmp.ne.s32.totalorder %s2988_s23, %s2612_s20  ;;  %p2618_p6 = scmp.lt.u32.totalorder %s2988_s23, %s3445_s1 }
  0x95   : > { %p2619_p10 = scmp.lt.u32.totalorder %s2617_s3, %s2612_s20  ;;  %p2621_p7 = scmp.lt.u32.totalorder %s2612_s20, %s2988_s23 }
  0x96   : > { %p2615_p8 = pnand %p2613_p0, %p2584_p9 }
  0x97   : > { %p2620_p3 = por %p2619_p10, %p2618_p6 }
  0x98   : > { %p2616_p13 = pneg %p2615_p8 }
  0x99   : > { %p2622_p12 = por %p2621_p7, %p2620_p3 }
  0x9b   : > { %p2623_p1 = pnand %p2622_p12, %p2616_p13 }
  0x9d   : > { %2626 = shalt.err (!%p2623_p1)
}
  0x9e   : > { %s2627_s16 = scalar_lea.vmem %s3023_s12, 256  ;;  %s2760_s10 = smov [#allocation5]  }
  0x9f   : > { %p2628_p2 = scmp.ne.s32.totalorder %s3023_s12, %s2627_s16  ;;  %s2632_s14 = sshll.u32 %s2760_s10, 4  ;;  %s2633_s14 = int_to_ptr.vmem [resolvable:$false] %s2632_s14 }
  0xa0   : > { %s2634_s0 = scalar_lea.vmem %s2633_s14, 512  ;;  %p2635_p8 = scmp.lt.s32.totalorder %s3023_s12, %s2633_s14 }
  0xa1   : > { %p2630_p4 = pnand %p2628_p2, %p2584_p9  ;;  %p2636_p6 = scmp.lt.s32.totalorder %s2634_s0, %s2627_s16 }
  0xa3   : > { %p2631_p0 = pneg %p2630_p4  ;;  %p2637_p10 = por %p2636_p6, %p2635_p8 }
  0xa5   : > { %p2638_p3 = pnand %p2637_p10, %p2631_p0 }
  0xa7   : > { %2641 = shalt.err (!%p2638_p3)
}
  0xa8   : > { %2338 = dma.hbm_to_vmem [thread:$0]  (!%p2979_p11), %s2988_s23, 256, %s3023_s12, %s3025_s11, %s3479_s4, %s3479_s4, %s3478_s2  }
  0xa9   : > { %p3480_p9 = scmp.ne.s32.totalorder %s3467_s9, 0 }
  0xaa   : > { %s3057_s18 = sand.u32 (!%p3480_p9), 1, %s2744_s25   ;;  %p3481_p13 = scmp.ne.s32.totalorder (!%p3480_p9), %s3464_s30, 0 }
  0xab   : > { %323 = sbr.rel (%p3480_p9) target bundleno = 1683 (0x693), region = 44  ;;  %s3060_s29 = sshll.u32 (!%p3480_p9), %s3057_s18, 4 }
  0xac   : > { %s326_s8 = scalar_lea.sflag (!%p3480_p9), [#allocation3], %s3057_s18  ;;  %s329_s13 = scalar_lea.vmem (!%p3480_p9), [#allocation2], %s3060_s29 }
  0xb2   : > { %2715 = dma.done.wait (%p3481_p13), %s326_s8, 256  }
  0xb3   : > { %2717 = vsyncadd (%p3481_p13), %s326_s8, 4294967040  ;;  %s334_s9 = sand.u32 1, %s2832_s28   ;;  %s338_s2 = scalar_lea.vmem [#allocation5], %s3060_s29 }
  0xb4   : > { %s335_s23 = scalar_lea.sflag [#allocation6], %s334_s9 }
  0xb5   : > { %2719 = dma.done.wait (%p3481_p13), %s335_s23, 256  }
  0xb6   : > { %2721 = vsyncadd (%p3481_p13), %s335_s23, 4294967040  ;;  %p3482_p11 = scmp.eq.s32.totalorder %s2832_s28, 0 }
  0xb8   : > { %2723 = dma.done.wait (%p3482_p11), [#allocation6], 512   ;;  %p3483_p7 = pmov %p3482_p11 }
  0xba   : > { %2725 = vsyncadd (%p3483_p7), [#allocation6], 4294966784  ;;  %p3484_p12 = pmov %p3483_p7 }
  0xbb   : > { %p3485_p1 = pmov %p3483_p7 }
  0xbc   : > { %2727 = dma.done.wait (%p3484_p12), [#allocation9], 1024  }
  0xbd   : > { %2729 = vsyncadd (%p3485_p1), [#allocation9], 4294966272  ;;  %v501_v0 = vld [vmem:[#allocation8] sm:$0xff]  ;;  %v502_v1 = vld [vmem:[#allocation8 + $0x8] sm:$0xff]  ;;  %vm399_vm0 = vcmask 261120   ;;  %vm622_vm1 = vcmask 64512  }
  0xbe   : > { %v395_v2 = vld [vmem:[#allocation7] sm:$0xff]  ;;  %v2244_v3 = vpack.c.bf16 %v502_v1, %v501_v0  ;;  %v396_v4 = vld [vmem:[#allocation7 + $0x8] sm:$0xff]  ;;  %v503_v5 = vld [vmem:[#allocation8 + $0x10] sm:$0xff]  ;;  %s2761_s30 = smov 104   ;;  %s2762_s4 = smov 120   ;;  %vm1011_vm3 = vcmask 130048  }
  0xbf   : > { %v504_v6 = vld [vmem:[#allocation8 + $0x18] sm:$0xff]  ;;  %v2236_v7 = vpack.c.bf16 %v396_v4, %v395_v2  ;;  %v391_v9 = vld [vmem:[%s329_s13] sm:$0xff]  ;;  %vm3100_vm2 = vmpackc.low %vm622_vm1, %vm622_vm1  ;;  %s2763_s12 = smov 112   ;;  %s2764_s17 = smov 96   ;;  %vm1656_vm4 = vcmask 195584  }
  0xc0   : > { %v2248_v8 = vpack.c.bf16 %v504_v6, %v503_v5  ;;  %v397_v10 = vld [vmem:[#allocation7 + $0x10] sm:$0xff]  ;;  %v398_v11 = vld [vmem:[#allocation7 + $0x18] sm:$0xff]  ;;  %2245 = vmatprep.subr.bf16.mxu1 %v2244_v3  ;;  %2139 = vmatprep.mubr.msk.f32.mxu1 %vm399_vm0, %v391_v9  ;;  %s2765_s11 = smov 8   ;;  %s2766_s20 = smov 16  }
  0xc1   : > { %v2240_v12 = vpack.c.bf16 %v398_v11, %v397_v10  ;;  %2247 = vmatpush3.bf16.msra.mxu1 %v2244_v3  ;;  %2237 = vmatprep.subr.bf16.mxu0 %v2236_v7  ;;  %v392_v13 = vld [vmem:[%s329_s13 + $0x8] sm:$0xff]  ;;  %v393_v14 = vld [vmem:[%s338_s2] sm:$0xff]  ;;  %s2767_s15 = smov 24   ;;  %s383_s21 = scalar_lea.vmem [#allocation11], %s3060_s29 }
  0xc2   : > { %2249 = vmatprep.subr.bf16.mxu1 %v2248_v8  ;;  %2239 = vmatpush3.bf16.msra.mxu0 %v2236_v7  ;;  %v394_v15 = vld [vmem:[%s338_s2 + $0x8] sm:$0xff]  ;;  %s1792_s3 = sshll.u32 %s383_s21, 4  ;;  %s2045_s14 = sshll.u32 %s2832_s28, 8  ;;  %s3344_s3 = int_to_ptr.vmem [resolvable:$true] %s1792_s3 }
  0xc3   : > { %2241 = vmatprep.subr.bf16.mxu0 %v2240_v12  ;;  %2125 = vmatprep.mubr.msk.f32.mxu0 %vm399_vm0, %v391_v9  ;;  %s3347_s0 = scalar_lea.vmem [#allocation12], %s3060_s29  ;;  %s3355_s23 = scalar_lea.hbm %s3450_s6, %s2045_s14 }
  0xc4   : > { %s1808_s8 = sshll.u32 %s3347_s0, 4  ;;  %s1774_s29 = scalar_lea.sflag [#allocation4], %s3057_s18  ;;  %s3359_s8 = int_to_ptr.vmem [resolvable:$true] %s1808_s8 }
  0xc5   : > { %2251 = vmatpush3.bf16.msra.mxu1 %v2248_v8  ;;  %s2642_s2 = scalar_lea.vmem %s3344_s3, 256 }
  0xc6   : > { %2243 = vmatpush3.bf16.msra.mxu0 %v2240_v12  ;;  %p2643_p2 = scmp.ne.s32.totalorder %s3344_s3, %s2642_s2 }
  0xc8   : > { %2140 = vmatmul.mubr.msk.f32.vlgmr.msra.gmra.mrb[0].mxu1 %vm399_vm0, %v392_v13  ;;  %p2644_p4 = pnand %p2643_p2, %p2965_p5 }
  0xc9   : > { %2126 = vmatmul.mubr.msk.f32.vlgmr.msra.gmra.mrb[0].mxu0 %vm399_vm0, %v392_v13 }
  0xca   : > { %2128 = vmatprep.mubr.msk.f32.mxu0 %vm399_vm0, %v393_v14  ;;  %p2645_p0 = pneg %p2644_p4 }
  0xcd   : > { %2129 = vmatmul.mubr.msk.f32.gmra.mrb[2].mxu0 %vm399_vm0, %v394_v15 }
 0x19b   : > { %v2141_v16 = vpop.f32.mrb[0].mxu1 }
 0x19c   : > { %v571_v17 = vpop.f32.mrb[1].mxu1  ;;  %v2127_v18 = vpop.f32.mrb[0].mxu0 }
 0x19d   : > { %v3096_v19 = vpack.i.bf16 %v2141_v16, %v571_v17  ;;  %v2252_v20 = vpack.c.bf16 %v2141_v16, %v571_v17  ;;  %v478_v22 = vpop.f32.mrb[1].mxu0  ;;  %v498_v26 = vmul.f32 0.35355338, %v2127_v18 }
 0x19e   : > { %v497_v23 = vmul.f32 0.35355338, %v478_v22 }
 0x19f   : > { %2410 = vrot.lane.b32.xlu1 %v3096_v19, %s2761_s30  ;;  %2400 = vrot.lane.b32.xlu0 %v3096_v19, %s2762_s4 }
 0x1a0   : > { %2254 = vmatprep.subr.msk.bf16.mxu0 %vm3100_vm2, %v2252_v20  ;;  %2146 = vmatprep.mubr.msk.f32.mxu0 %vm622_vm1, %v497_v23  ;;  %v2130_v24 = vpop.f32.mrb[2].mxu0 }
 0x1a1   : > { %2257 = vmatpush3.bf16.xpose.msk.msra.mxu0 %vm3100_vm2, %v2252_v20  ;;  %v488_v25 = vpop.f32.mrb[3].mxu0  ;;  %v500_v28 = vmul.f32 0.35355338, %v2130_v24 }
 0x1a2   : > { %v499_v27 = vmul.f32 0.35355338, %v488_v25 }
 0x1a3   : > { %2405 = vrot.lane.b32.xlu0 %v3096_v19, %s2763_s12  ;;  %584 = vrot.lane.b32.xlu1 %v497_v23, %s2762_s4 }
 0x1a7   : > { %586 = vrot.lane.b32.xlu0 %v498_v26, %s2762_s4  ;;  %592 = vrot.lane.b32.xlu1 %v497_v23, %s2763_s12 }
 0x1a8   : > { %2147 = vmatmul.mubr.msk.f32.vlgmr.msra.gmra.mrb[4].mxu0 %vm622_vm1, %v498_v26 }
 0x1a9   : > { %2149 = vmatprep.mubr.msk.f32.mxu0 %vm622_vm1, %v499_v27 }
 0x1ab   : > { %594 = vrot.lane.b32.xlu0 %v498_v26, %s2763_s12  ;;  %600 = vrot.lane.b32.xlu1 %v497_v23, %s2761_s30 }
 0x1ac   : > { %2150 = vmatmul.mubr.msk.f32.gmra.mrb[6].mxu0 %vm622_vm1, %v500_v28 }
 0x1af   : > { %602 = vrot.lane.b32.xlu0 %v498_v26, %s2761_s30  ;;  %588 = vrot.lane.b32.xlu1 %v499_v27, %s2762_s4 }
 0x1b3   : > { %590 = vrot.lane.b32.xlu0 %v500_v28, %s2762_s4  ;;  %596 = vrot.lane.b32.xlu1 %v499_v27, %s2763_s12 }
 0x1b7   : > { %598 = vrot.lane.b32.xlu0 %v500_v28, %s2763_s12  ;;  %604 = vrot.lane.b32.xlu1 %v499_v27, %s2761_s30 }
 0x1bb   : > { %606 = vrot.lane.b32.xlu0 %v500_v28, %s2761_s30  ;;  %s2768_s30 = smov [#allocation11]  }
 0x1bc   : > { %s2646_s4 = sshll.u32 %s2768_s30, 4  ;;  %s2647_s4 = int_to_ptr.vmem [resolvable:$false] %s2646_s4 }
 0x1bd   : > { %s2648_s12 = scalar_lea.vmem %s2647_s4, 512  ;;  %p2649_p8 = scmp.lt.s32.totalorder %s3344_s3, %s2647_s4 }
 0x1be   : > { %p2650_p6 = scmp.lt.s32.totalorder %s2648_s12, %s2642_s2 }
 0x1c0   : > { %p2651_p10 = por %p2650_p6, %p2649_p8 }
 0x1c2   : > { %p2652_p3 = pnand %p2651_p10, %p2645_p0 }
 0x211   : > { %v3115_v29 = vpop.permute.xlu1 %2410  ;;  %v3117_v30 = vpop.permute.xlu0 %2400 }
 0x212   : > { %v2413_v31 = vunpack.i.h.bf16 %v3115_v29  ;;  %v2412_v32 = vunpack.i.l.bf16 %v3115_v29  ;;  %v2403_v33 = vunpack.i.h.bf16 %v3117_v30  ;;  %v2402_v34 = vunpack.i.l.bf16 %v3117_v30 }
 0x214   : > { %v2258_v35 = vpack.c.bf16 %v2403_v33, %v2402_v34  ;;  %v2270_v38 = vpack.c.bf16 %v2413_v31, %v2412_v32 }
 0x215   : > { %v3123_v36 = vpop.permute.xlu0 %2405  ;;  %v585_v37 = vpop.permute.xlu1 %584 }
 0x216   : > { %v2408_v39 = vunpack.i.h.bf16 %v3123_v36  ;;  %v2407_v40 = vunpack.i.l.bf16 %v3123_v36  ;;  %2260 = vmatprep.subr.msk.bf16.mxu1 %vm3100_vm2, %v2258_v35  ;;  %2156 = vmatprep.mubr.msk.f32.mxu1 %vm622_vm1, %v585_v37 }
 0x217   : > { %2263 = vmatpush3.bf16.xpose.msk.msra.mxu1 %vm3100_vm2, %v2258_v35 }
 0x218   : > { %v2264_v41 = vpack.c.bf16 %v2408_v39, %v2407_v40  ;;  %2272 = vmatprep.subr.msk.bf16.mxu1 %vm3100_vm2, %v2270_v38 }
 0x219   : > { %v587_v42 = vpop.permute.xlu0 %586  ;;  %v593_v43 = vpop.permute.xlu1 %592 }
 0x21a   : > { %2266 = vmatprep.subr.msk.bf16.mxu0 %vm3100_vm2, %v2264_v41  ;;  %2166 = vmatprep.mubr.msk.f32.mxu0 %vm622_vm1, %v593_v43 }
 0x21b   : > { %2269 = vmatpush3.bf16.xpose.msk.msra.mxu0 %vm3100_vm2, %v2264_v41 }
 0x21d   : > { %v595_v44 = vpop.permute.xlu0 %594  ;;  %v601_v45 = vpop.permute.xlu1 %600 }
 0x21e   : > { %2157 = vmatmul.mubr.msk.f32.vlgmr.msra.gmra.mrb[2].mxu1 %vm622_vm1, %v587_v42 }
 0x21f   : > { %2275 = vmatpush3.bf16.xpose.msk.msra.mxu1 %vm3100_vm2, %v2270_v38 }
 0x221   : > { %v603_v46 = vpop.permute.xlu0 %602  ;;  %v589_v47 = vpop.permute.xlu1 %588 }
 0x222   : > { %2167 = vmatmul.mubr.msk.f32.vlgmr.msra.gmra.mrb[8].mxu0 %vm622_vm1, %v595_v44  ;;  %2159 = vmatprep.mubr.msk.f32.mxu1 %vm622_vm1, %v589_v47 }
 0x225   : > { %v591_v48 = vpop.permute.xlu0 %590  ;;  %v597_v49 = vpop.permute.xlu1 %596 }
 0x226   : > { %2160 = vmatmul.mubr.msk.f32.gmra.mrb[4].mxu1 %vm622_vm1, %v591_v48  ;;  %2169 = vmatprep.mubr.msk.f32.mxu0 %vm622_vm1, %v597_v49 }
 0x227   : > { %2176 = vmatprep.mubr.msk.f32.mxu1 %vm622_vm1, %v601_v45 }
 0x229   : > { %v599_v50 = vpop.permute.xlu0 %598  ;;  %v605_v51 = vpop.permute.xlu1 %604 }
 0x22a   : > { %2170 = vmatmul.mubr.msk.f32.gmra.mrb[10].mxu0 %vm622_vm1, %v599_v50  ;;  %2177 = vmatmul.mubr.msk.f32.vlgmr.msra.gmra.mrb[6].mxu1 %vm622_vm1, %v603_v46 }
 0x22b   : > { %2179 = vmatprep.mubr.msk.f32.mxu1 %vm622_vm1, %v605_v51 }
 0x22d   : > { %v607_v52 = vpop.permute.xlu0 %606 }
 0x22e   : > { %2180 = vmatmul.mubr.msk.f32.gmra.mrb[8].mxu1 %vm622_vm1, %v607_v52 }
 0x27b   : > { %v2148_v53 = vpop.f32.mrb[4].mxu0 }
 0x27c   : > { %v701_v54 = vpop.f32.mrb[5].mxu0  ;;  %v1015_v55 = vsel %vm1011_vm3, %v2148_v53, -inf }
 0x27d   : > { %1016 = vmax.xlane.f32.xlu1 %v1015_v55  ;;  %v1012_v56 = vsel %vm1011_vm3, %v701_v54, -inf }
 0x27e   : > { %1013 = vmax.xlane.f32.xlu0 %v1012_v56 }
 0x27f   : > { %v2151_v57 = vpop.f32.mrb[6].mxu0 }
 0x280   : > { %v711_v58 = vpop.f32.mrb[7].mxu0  ;;  %v1021_v59 = vsel %vm1011_vm3, %v2151_v57, -inf }
 0x281   : > { %v1018_v60 = vsel %vm1011_vm3, %v711_v58, -inf }
 0x282   : > { %1022 = vmax.xlane.f32.xlu0 %v1021_v59  ;;  %1019 = vmax.xlane.f32.xlu1 %v1018_v60 }
 0x2f1   : > { %v3155_v61 = vpop.f32.mrb[2].mxu1 }
 0x2f2   : > { %v3157_v62 = vpop.f32.mrb[3].mxu1  ;;  %v1027_v63 = vsel %vm1011_vm3, %v3155_v61, -inf }
 0x2f3   : > { %1028 = vmax.xlane.f32.xlu1 %v1027_v63  ;;  %v1024_v0 = vsel %vm1011_vm3, %v3157_v62, -inf }
 0x2f4   : > { %1025 = vmax.xlane.f32.xlu0 %v1024_v0 }
 0x2f5   : > { %v3163_v1 = vpop.f32.mrb[8].mxu0 }
 0x2f6   : > { %v3165_v2 = vpop.f32.mrb[9].mxu0  ;;  %v1039_v3 = vsel %vm1011_vm3, %v3163_v1, -inf }
 0x2f7   : > { %1040 = vmax.xlane.f32.xlu1 %v1039_v3  ;;  %v1036_v4 = vsel %vm1011_vm3, %v3165_v2, -inf }
 0x2f8   : > { %1037 = vmax.xlane.f32.xlu0 %v1036_v4 }
 0x2f9   : > { %v3171_v5 = vpop.f32.mrb[4].mxu1 }
 0x2fa   : > { %v3173_v6 = vpop.f32.mrb[5].mxu1  ;;  %v1033_v7 = vsel %vm1011_vm3, %v3171_v5, -inf }
 0x2fb   : > { %1034 = vmax.xlane.f32.xlu1 %v1033_v7  ;;  %v1030_v8 = vsel %vm1011_vm3, %v3173_v6, -inf }
 0x2fc   : > { %1031 = vmax.xlane.f32.xlu0 %v1030_v8 }
 0x2fd   : > { %v3179_v9 = vpop.f32.mrb[10].mxu0  ;;  %v3181_v10 = vpop.f32.mrb[6].mxu1 }
 0x2fe   : > { %v3183_v11 = vpop.f32.mrb[11].mxu0  ;;  %v3185_v12 = vpop.f32.mrb[7].mxu1  ;;  %v1045_v13 = vsel %vm1011_vm3, %v3179_v9, -inf  ;;  %v1051_v17 = vsel %vm1011_vm3, %v3181_v10, -inf }
 0x2ff   : > { %1046 = vmax.xlane.f32.xlu1 %v1045_v13  ;;  %v1042_v14 = vsel %vm1011_vm3, %v3183_v11, -inf  ;;  %v1048_v18 = vsel %vm1011_vm3, %v3185_v12, -inf }
 0x300   : > { %1043 = vmax.xlane.f32.xlu0 %v1042_v14 }
 0x301   : > { %v3191_v15 = vpop.f32.mrb[8].mxu1 }
 0x302   : > { %v3193_v16 = vpop.f32.mrb[9].mxu1  ;;  %v1057_v20 = vsel %vm1011_vm3, %v3191_v15, -inf }
 0x303   : > { %1052 = vmax.xlane.f32.xlu1 %v1051_v17  ;;  %v1054_v21 = vsel %vm1011_vm3, %v3193_v16, -inf }
 0x304   : > { %1049 = vmax.xlane.f32.xlu0 %v1048_v18 }
 0x307   : > { %1058 = vmax.xlane.f32.xlu1 %v1057_v20 }
 0x308   : > { %1055 = vmax.xlane.f32.xlu0 %v1054_v21 }
 0x30a   : > { %v1017_v23 = vpop.xlane.xlu1 %1016 }
 0x30b   : > { %v1014_v22 = vpop.xlane.xlu0 %1013  ;;  %v1061_v24 = vsub.f32 %v2148_v53, %v1017_v23 }
 0x30c   : > { %v1060_v25 = vsub.f32 %v701_v54, %v1014_v22 }
 0x30d   : > { %v1078_v28 = vmul.f32 1.442695, %v1061_v24 }
 0x30e   : > { %v1076_v32 = vmul.f32 1.442695, %v1060_v25 }
 0x30f   : > { %v1023_v26 = vpop.xlane.xlu0 %1022  ;;  %v1020_v27 = vpop.xlane.xlu1 %1019  ;;  %2434 = vpow2.f32 %v1078_v28 }
 0x310   : > { %v1063_v31 = vsub.f32 %v2151_v57, %v1023_v26  ;;  %v1062_v33 = vsub.f32 %v711_v58, %v1020_v27  ;;  %2436 = vpow2.f32 %v1076_v32 }
 0x312   : > { %v1082_v34 = vmul.f32 1.442695, %v1063_v31  ;;  %v1080_v35 = vmul.f32 1.442695, %v1062_v33 }
 0x314   : > { %2438 = vpow2.f32 %v1082_v34 }
 0x315   : > { %2440 = vpow2.f32 %v1080_v35 }
 0x318   : > { %2420 = vrot.lane.b32.xlu1 %v3117_v30, %s2764_s17 }
 0x319   : > { %v3207_v30 = vpop.eup %2434 }
 0x31a   : > { %v3209_v37 = vpop.eup %2436 }
 0x31b   : > { %v1108_v39 = vsel %vm1011_vm3, %v3209_v37, 0.0 }
 0x31e   : > { %2415 = vrot.lane.b32.xlu0 %v3096_v19, %s2764_s17  ;;  %v1111_v19 = vsel %vm1011_vm3, %v3207_v30, 0.0  ;;  %v3213_v38 = vpop.eup %2438 }
 0x31f   : > { %v3217_v40 = vpop.eup %2440  ;;  %v1117_v41 = vsel %vm1011_vm3, %v3213_v38, 0.0 }
 0x320   : > { %v1114_v42 = vsel %vm1011_vm3, %v3217_v40, 0.0 }
 0x33c   : > { %1112 = vadd.xlane.f32.xlu1 %v1111_v19 }
 0x33d   : > { %1109 = vadd.xlane.f32.xlu0 %v1108_v39 }
 0x340   : > { %1118 = vadd.xlane.f32.xlu1 %v1117_v41 }
 0x341   : > { %1115 = vadd.xlane.f32.xlu0 %v1114_v42 }
 0x380   : > { %v1029_v43 = vpop.xlane.xlu1 %1028 }
 0x381   : > { %v1065_v44 = vsub.f32 %v3155_v61, %v1029_v43  ;;  %v1026_v45 = vpop.xlane.xlu0 %1025 }
 0x382   : > { %v1064_v46 = vsub.f32 %v3157_v62, %v1026_v45 }
 0x383   : > { %v1086_v47 = vmul.f32 1.442695, %v1065_v44 }
 0x384   : > { %v1084_v48 = vmul.f32 1.442695, %v1064_v46  ;;  %v1041_v49 = vpop.xlane.xlu1 %1040 }
 0x385   : > { %2442 = vpow2.f32 %v1086_v47  ;;  %v1069_v50 = vsub.f32 %v3163_v1, %v1041_v49  ;;  %v1038_v51 = vpop.xlane.xlu0 %1037 }
 0x386   : > { %2444 = vpow2.f32 %v1084_v48  ;;  %v1068_v52 = vsub.f32 %v3165_v2, %v1038_v51 }
 0x387   : > { %v1094_v53 = vmul.f32 1.442695, %v1069_v50 }
 0x388   : > { %v1092_v54 = vmul.f32 1.442695, %v1068_v52  ;;  %v1035_v55 = vpop.xlane.xlu1 %1034 }
 0x389   : > { %2446 = vpow2.f32 %v1094_v53  ;;  %v1067_v56 = vsub.f32 %v3171_v5, %v1035_v55  ;;  %v1032_v57 = vpop.xlane.xlu0 %1031 }
 0x38a   : > { %2448 = vpow2.f32 %v1092_v54  ;;  %v1066_v58 = vsub.f32 %v3173_v6, %v1032_v57 }
 0x38b   : > { %v1090_v59 = vmul.f32 1.442695, %v1067_v56 }
 0x38c   : > { %v1088_v60 = vmul.f32 1.442695, %v1066_v58  ;;  %v1047_v61 = vpop.xlane.xlu1 %1046 }
 0x38d   : > { %2450 = vpow2.f32 %v1090_v59  ;;  %v1071_v62 = vsub.f32 %v3179_v9, %v1047_v61  ;;  %v1044_v63 = vpop.xlane.xlu0 %1043 }
 0x38e   : > { %2452 = vpow2.f32 %v1088_v60  ;;  %v1070_v0 = vsub.f32 %v3183_v11, %v1044_v63 }
 0x38f   : > { %v3231_v1 = vpop.eup %2442  ;;  %v1098_v2 = vmul.f32 1.442695, %v1071_v62 }
 0x390   : > { %v3233_v3 = vpop.eup %2444  ;;  %v1096_v4 = vmul.f32 1.442695, %v1070_v0  ;;  %v1053_v5 = vpop.xlane.xlu1 %1052  ;;  %v1123_v6 = vsel %vm1011_vm3, %v3231_v1, 0.0 }
 0x391   : > { %2454 = vpow2.f32 %v1098_v2  ;;  %v1073_v7 = vsub.f32 %v3181_v10, %v1053_v5  ;;  %1124 = vadd.xlane.f32.xlu1 %v1123_v6  ;;  %v1050_v8 = vpop.xlane.xlu0 %1049  ;;  %v1120_v9 = vsel %vm1011_vm3, %v3233_v3, 0.0 }
 0x392   : > { %2456 = vpow2.f32 %v1096_v4  ;;  %v1072_v11 = vsub.f32 %v3185_v12, %v1050_v8  ;;  %1121 = vadd.xlane.f32.xlu0 %v1120_v9 }
 0x393   : > { %v3241_v13 = vpop.eup %2446  ;;  %v1102_v14 = vmul.f32 1.442695, %v1073_v7 }
 0x394   : > { %v3243_v17 = vpop.eup %2448  ;;  %v1100_v18 = vmul.f32 1.442695, %v1072_v11  ;;  %v1059_v20 = vpop.xlane.xlu1 %1058  ;;  %v1135_v21 = vsel %vm1011_vm3, %v3241_v13, 0.0 }
 0x395   : > { %2458 = vpow2.f32 %v1102_v14  ;;  %v1075_v10 = vsub.f32 %v3191_v15, %v1059_v20  ;;  %1136 = vadd.xlane.f32.xlu1 %v1135_v21  ;;  %v1056_v22 = vpop.xlane.xlu0 %1055  ;;  %v1132_v23 = vsel %vm1011_vm3, %v3243_v17, 0.0 }
 0x396   : > { %2460 = vpow2.f32 %v1100_v18  ;;  %v1074_v12 = vsub.f32 %v3193_v16, %v1056_v22  ;;  %1133 = vadd.xlane.f32.xlu0 %v1132_v23 }
 0x397   : > { %v3251_v24 = vpop.eup %2450  ;;  %v1106_v25 = vmul.f32 1.442695, %v1075_v10 }
 0x398   : > { %v3253_v26 = vpop.eup %2452  ;;  %v1104_v27 = vmul.f32 1.442695, %v1074_v12  ;;  %v2421_v28 = vpop.permute.xlu1 %2420  ;;  %v1129_v31 = vsel %vm1011_vm3, %v3251_v24, 0.0 }
 0x399   : > { %2462 = vpow2.f32 %v1106_v25  ;;  %1130 = vadd.xlane.f32.xlu1 %v1129_v31  ;;  %v2416_v15 = vpop.permute.xlu0 %2415  ;;  %v1126_v32 = vsel %vm1011_vm3, %v3253_v26, 0.0  ;;  %v2423_v35 = vunpack.i.h.bf16 %v2421_v28  ;;  %v2422_v19 = vunpack.i.l.bf16 %v2421_v28 }
 0x39a   : > { %2464 = vpow2.f32 %v1104_v27  ;;  %v2418_v33 = vunpack.i.h.bf16 %v2416_v15  ;;  %v2417_v16 = vunpack.i.l.bf16 %v2416_v15  ;;  %1127 = vadd.xlane.f32.xlu0 %v1126_v32 }
 0x39b   : > { %v3259_v34 = vpop.eup %2454  ;;  %v2280_v45 = vpack.c.bf16 %v2423_v35, %v2422_v19 }
 0x39c   : > { %v3261_v39 = vpop.eup %2456  ;;  %v2276_v41 = vpack.c.bf16 %v2418_v33, %v2417_v16  ;;  %v1141_v42 = vsel %vm1011_vm3, %v3259_v34, 0.0 }
 0x39d   : > { %1142 = vadd.xlane.f32.xlu1 %v1141_v42  ;;  %v1138_v43 = vsel %vm1011_vm3, %v3261_v39, 0.0 }
 0x39e   : > { %1139 = vadd.xlane.f32.xlu0 %v1138_v43  ;;  %2277 = vmatprep.subr.bf16.mxu0 %v2276_v41 }
 0x39f   : > { %v3267_v44 = vpop.eup %2458  ;;  %2300 = vmatprep.subr.bf16.mxu1 %v2276_v41  ;;  %2279 = vmatpush3.bf16.msra.mxu0 %v2276_v41 }
 0x3a0   : > { %v3269_v46 = vpop.eup %2460  ;;  %2301 = vmatpush3.bf16.msra.mxu1 %v2276_v41  ;;  %v1147_v47 = vsel %vm1011_vm3, %v3267_v44, 0.0 }
 0x3a1   : > { %2281 = vmatprep.subr.bf16.mxu1 %v2280_v45  ;;  %1148 = vadd.xlane.f32.xlu1 %v1147_v47  ;;  %v1144_v48 = vsel %vm1011_vm3, %v3269_v46, 0.0 }
 0x3a2   : > { %1145 = vadd.xlane.f32.xlu0 %v1144_v48 }
 0x3a3   : > { %v3275_v49 = vpop.eup %2462 }
 0x3a4   : > { %v3277_v50 = vpop.eup %2464  ;;  %v1153_v51 = vsel %vm1011_vm3, %v3275_v49, 0.0 }
 0x3a5   : > { %1154 = vadd.xlane.f32.xlu1 %v1153_v51  ;;  %v1150_v52 = vsel %vm1011_vm3, %v3277_v50, 0.0 }
 0x3a6   : > { %1151 = vadd.xlane.f32.xlu0 %v1150_v52 }
 0x3b6   : > { %2425 = vrot.lane.b32.xlu1 %v3123_v36, %s2764_s17 }
 0x3bc   : > { %2430 = vrot.lane.b32.xlu0 %v3115_v29, %s2764_s17 }
 0x3c9   : > { %v1113_v53 = vpop.xlane.xlu1 %1112 }
 0x3ca   : > { %2466 = vrcp.f32 %v1113_v53  ;;  %v1110_v54 = vpop.xlane.xlu0 %1109 }
 0x3cb   : > { %2468 = vrcp.f32 %v1110_v54 }
 0x3cd   : > { %v1119_v55 = vpop.xlane.xlu1 %1118 }
 0x3ce   : > { %2470 = vrcp.f32 %v1119_v55  ;;  %v1116_v56 = vpop.xlane.xlu0 %1115  ;;  %v1662_v55 = vld [vmem:[#allocation10 + $0x8] sm:$0xff] }
 0x3cf   : > { %2472 = vrcp.f32 %v1116_v56  ;;  %v1663_v56 = vld [vmem:[#allocation10 + $0x10] sm:$0xff] }
 0x3d4   : > { %v2467_v57 = vpop.eup %2466 }
 0x3d5   : > { %v2469_v58 = vpop.eup %2468  ;;  %v1173_v60 = vmul.f32 %v2467_v57, %v3207_v30  ;;  %v1664_v57 = vld [vmem:[#allocation10 + $0x18] sm:$0xff] }
 0x3d6   : > { %v1172_v59 = vmul.f32 %v2469_v58, %v3209_v37  ;;  %v2296_v58 = vpack.c.bf16 %v1664_v57, %v1663_v56 }
 0x3d8   : > { %v2471_v61 = vpop.eup %2470  ;;  %2186 = vmatprep.mubr.msk.f32.mxu0 %vm1011_vm3, %v1172_v59 }
 0x3d9   : > { %v2473_v36 = vpop.eup %2472  ;;  %2187 = vmatmul.mubr.msk.f32.vlgmr.msra.gmra.mrb[12].mxu0 %vm1011_vm3, %v1173_v60  ;;  %v1175_v62 = vmul.f32 %v2471_v61, %v3213_v38 }
 0x3da   : > { %v1174_v29 = vmul.f32 %v2473_v36, %v3217_v40 }
 0x3dc   : > { %2189 = vmatprep.mubr.msk.f32.mxu1 %vm1011_vm3, %v1174_v29 }
 0x3dd   : > { %2190 = vmatmul.mubr.msk.f32.vlgmr.msra.gmra.mrb[10].mxu1 %vm1011_vm3, %v1175_v62 }
 0x3de   : > { %2283 = vmatpush3.bf16.msra.mxu1 %v2280_v45 }
 0x41e   : > { %v1125_v63 = vpop.xlane.xlu1 %1124 }
 0x41f   : > { %2474 = vrcp.f32 %v1125_v63  ;;  %v1122_v37 = vpop.xlane.xlu0 %1121 }
 0x420   : > { %2476 = vrcp.f32 %v1122_v37 }
 0x422   : > { %v1137_v30 = vpop.xlane.xlu1 %1136 }
 0x423   : > { %v1134_v0 = vpop.xlane.xlu0 %1133 }
 0x424   : > { %2478 = vrcp.f32 %v1134_v0 }
 0x426   : > { %v1131_v2 = vpop.xlane.xlu1 %1130 }
 0x427   : > { %2480 = vrcp.f32 %v1131_v2  ;;  %v1128_v4 = vpop.xlane.xlu0 %1127 }
 0x428   : > { %2482 = vrcp.f32 %v1128_v4 }
 0x429   : > { %v2475_v5 = vpop.eup %2474  ;;  %2484 = vrcp.f32 %v1137_v30 }
 0x42a   : > { %v2477_v40 = vpop.eup %2476  ;;  %v1143_v6 = vpop.xlane.xlu1 %1142  ;;  %v1177_v8 = vmul.f32 %v2475_v5, %v3231_v1 }
 0x42b   : > { %v1140_v38 = vpop.xlane.xlu0 %1139  ;;  %v1176_v7 = vmul.f32 %v2477_v40, %v3233_v3 }
 0x42c   : > { %2486 = vrcp.f32 %v1140_v38 }
 0x42d   : > { %2196 = vmatprep.mubr.msk.f32.mxu1 %vm1011_vm3, %v1176_v7 }
 0x42e   : > { %v2479_v9 = vpop.eup %2478  ;;  %v1149_v11 = vpop.xlane.xlu1 %1148  ;;  %2197 = vmatmul.mubr.msk.f32.vlgmr.msra.gmra.mrb[12].mxu1 %vm1011_vm3, %v1177_v8 }
 0x42f   : > { %v1146_v14 = vpop.xlane.xlu0 %1145  ;;  %v1180_v18 = vmul.f32 %v2479_v9, %v3243_v17 }
 0x430   : > { %2488 = vrcp.f32 %v1146_v14 }
 0x431   : > { %v2481_v20 = vpop.eup %2480  ;;  %2490 = vrcp.f32 %v1149_v11  ;;  %2206 = vmatprep.mubr.msk.f32.mxu0 %vm1011_vm3, %v1180_v18 }
 0x432   : > { %v2483_v21 = vpop.eup %2482  ;;  %v1155_v3 = vpop.xlane.xlu1 %1154  ;;  %2492 = vrcp.f32 %v1143_v6  ;;  %v1179_v22 = vmul.f32 %v2481_v20, %v3251_v24 }
 0x433   : > { %v1152_v1 = vpop.xlane.xlu0 %1151  ;;  %v1178_v10 = vmul.f32 %v2483_v21, %v3253_v26  ;;  %v2485_v27 = vpop.eup %2484 }
 0x434   : > { %2494 = vrcp.f32 %v1152_v1  ;;  %v1181_v19 = vmul.f32 %v2485_v27, %v3241_v13  ;;  %v2030_v27 = vld [vmem:[%s3449_s5] ss:$0 sm:$0xff] }
 0x435   : > { %2496 = vrcp.f32 %v1155_v3  ;;  %2199 = vmatprep.mubr.msk.f32.mxu1 %vm1011_vm3, %v1178_v10 }
 0x436   : > { %v2426_v23 = vpop.permute.xlu1 %2425  ;;  %2200 = vmatmul.mubr.msk.f32.gmra.mrb[14].mxu1 %vm1011_vm3, %v1179_v22  ;;  %v2487_v15 = vpop.eup %2486 }
 0x437   : > { %v2428_v17 = vunpack.i.h.bf16 %v2426_v23  ;;  %v2427_v12 = vunpack.i.l.bf16 %v2426_v23  ;;  %v2431_v25 = vpop.permute.xlu0 %2430  ;;  %v1182_v43 = vmul.f32 %v2487_v15, %v3261_v39 }
 0x438   : > { %v2433_v28 = vunpack.i.h.bf16 %v2431_v25  ;;  %v2432_v31 = vunpack.i.l.bf16 %v2431_v25 }
 0x439   : > { %v2284_v32 = vpack.c.bf16 %v2428_v17, %v2427_v12 }
 0x43a   : > { %v2489_v33 = vpop.eup %2488  ;;  %v2288_v16 = vpack.c.bf16 %v2433_v28, %v2432_v31 }
 0x43b   : > { %v2491_v26 = vpop.eup %2490  ;;  %2285 = vmatprep.subr.bf16.mxu0 %v2284_v32  ;;  %v1184_v24 = vmul.f32 %v2489_v33, %v3269_v46 }
 0x43c   : > { %2287 = vmatpush3.bf16.msra.mxu0 %v2284_v32  ;;  %2289 = vmatprep.subr.bf16.mxu1 %v2288_v16  ;;  %v2493_v35 = vpop.eup %2492  ;;  %v1185_v42 = vmul.f32 %v2491_v26, %v3267_v44 }
 0x43d   : > { %2291 = vmatpush3.bf16.msra.mxu1 %v2288_v16  ;;  %2216 = vmatprep.mubr.msk.f32.mxu1 %vm1011_vm3, %v1184_v24  ;;  %v1183_v13 = vmul.f32 %v2493_v35, %v3259_v34  ;;  %v1661_v34 = vld [vmem:[#allocation10] sm:$0xff] }
 0x43e   : > { %v2495_v41 = vpop.eup %2494 }
 0x43f   : > { %v2497_v45 = vpop.eup %2496  ;;  %2207 = vmatmul.mubr.msk.f32.vlgmr.msra.gmra.mrb[14].mxu0 %vm1011_vm3, %v1181_v19  ;;  %v1186_v47 = vmul.f32 %v2495_v41, %v3277_v50 }
 0x440   : > { %2209 = vmatprep.mubr.msk.f32.mxu0 %vm1011_vm3, %v1182_v43  ;;  %2217 = vmatmul.mubr.msk.f32.vlgmr.msra.gmra.mrb[16].mxu1 %vm1011_vm3, %v1185_v42  ;;  %v1187_v46 = vmul.f32 %v2497_v45, %v3275_v49  ;;  %v2292_v49 = vpack.c.bf16 %v1662_v55, %v1661_v34 }
 0x441   : > { %2219 = vmatprep.mubr.msk.f32.mxu1 %vm1011_vm3, %v1186_v47 }
 0x442   : > { %2293 = vmatprep.subr.bf16.mxu0 %v2292_v49 }
 0x443   : > { %2210 = vmatmul.mubr.msk.f32.gmra.mrb[16].mxu0 %vm1011_vm3, %v1183_v13 }
 0x444   : > { %2220 = vmatmul.mubr.msk.f32.gmra.mrb[18].mxu1 %vm1011_vm3, %v1187_v46  ;;  %2295 = vmatpush3.bf16.msra.mxu0 %v2292_v49 }
 0x445   : > { %2297 = vmatprep.subr.bf16.mxu0 %v2296_v58 }
 0x448   : > { %2299 = vmatpush3.bf16.msra.mxu0 %v2296_v58 }
 0x4ac   : > { %v2188_v39 = vpop.f32.mrb[12].mxu0 }
 0x4ad   : > { %v1272_v44 = vpop.f32.mrb[13].mxu0 }
 0x4b0   : > { %v2191_v48 = vpop.f32.mrb[10].mxu1 }
 0x4b1   : > { %v1282_v51 = vpop.f32.mrb[11].mxu1 }
 0x501   : > { %v2198_v52 = vpop.f32.mrb[12].mxu1 }
 0x502   : > { %1606 = vrot.lane.b32.xlu0 %v2198_v52, %s2765_s11  ;;  %v1375_v50 = vpop.f32.mrb[13].mxu1 }
 0x503   : > { %1604 = vrot.lane.b32.xlu1 %v1375_v50, %s2765_s11 }
 0x509   : > { %v2201_v53 = vpop.f32.mrb[14].mxu1 }
 0x50a   : > { %v1385_v54 = vpop.f32.mrb[15].mxu1 }
 0x512   : > { %v2208_v59 = vpop.f32.mrb[14].mxu0 }
 0x513   : > { %v2218_v60 = vpop.f32.mrb[16].mxu1  ;;  %1622 = vrot.lane.b32.xlu0 %v2208_v59, %s2766_s20  ;;  %v1478_v61 = vpop.f32.mrb[15].mxu0 }
 0x514   : > { %v1581_v36 = vpop.f32.mrb[17].mxu1  ;;  %1620 = vrot.lane.b32.xlu1 %v1478_v61, %s2766_s20 }
 0x516   : > { %v2211_v29 = vpop.f32.mrb[16].mxu0 }
 0x517   : > { %v2221_v62 = vpop.f32.mrb[18].mxu1  ;;  %1610 = vrot.lane.b32.xlu0 %v2201_v53, %s2765_s11  ;;  %v1488_v63 = vpop.f32.mrb[17].mxu0 }
 0x518   : > { %v1591_v37 = vpop.f32.mrb[19].mxu1  ;;  %1608 = vrot.lane.b32.xlu1 %v1385_v54, %s2765_s11 }
 0x51b   : > { %1626 = vrot.lane.b32.xlu0 %v2211_v29, %s2766_s20 }
 0x51c   : > { %1624 = vrot.lane.b32.xlu1 %v1488_v63, %s2766_s20 }
 0x51f   : > { %1638 = vrot.lane.b32.xlu0 %v2218_v60, %s2767_s15 }
 0x520   : > { %1636 = vrot.lane.b32.xlu1 %v1581_v36, %s2767_s15 }
 0x523   : > { %1642 = vrot.lane.b32.xlu0 %v2221_v62, %s2767_s15 }
 0x524   : > { %1640 = vrot.lane.b32.xlu1 %v1591_v37, %s2767_s15 }
 0x574   : > { %v1607_v30 = vpop.permute.xlu0 %1606 }
 0x575   : > { %v1605_v0 = vpop.permute.xlu1 %1604  ;;  %v1649_v9 = vsel %vm622_vm1, %v2188_v39, %v1607_v30 }
 0x576   : > { %v1648_v7 = vsel %vm622_vm1, %v1272_v44, %v1605_v0 }
 0x585   : > { %v1623_v2 = vpop.permute.xlu0 %1622 }
 0x586   : > { %v1621_v4 = vpop.permute.xlu1 %1620  ;;  %v1653_v18 = vsel %vm1011_vm3, %v1649_v9, %v1623_v2 }
 0x587   : > { %v1652_v11 = vsel %vm1011_vm3, %v1648_v7, %v1621_v4 }
 0x589   : > { %v1611_v5 = vpop.permute.xlu0 %1610 }
 0x58a   : > { %v1609_v40 = vpop.permute.xlu1 %1608  ;;  %v1651_v10 = vsel %vm622_vm1, %v2191_v48, %v1611_v5 }
 0x58b   : > { %v1650_v3 = vsel %vm622_vm1, %v1282_v51, %v1609_v40 }
 0x58d   : > { %v1627_v6 = vpop.permute.xlu0 %1626 }
 0x58e   : > { %v1625_v38 = vpop.permute.xlu1 %1624  ;;  %v1655_v17 = vsel %vm1011_vm3, %v1651_v10, %v1627_v6 }
 0x58f   : > { %v1654_v22 = vsel %vm1011_vm3, %v1650_v3, %v1625_v38 }
 0x591   : > { %v1639_v8 = vpop.permute.xlu0 %1638 }
 0x592   : > { %v1637_v14 = vpop.permute.xlu1 %1636  ;;  %v1658_v21 = vsel %vm1656_vm4, %v1653_v18, %v1639_v8 }
 0x593   : > { %v1657_v20 = vsel %vm1656_vm4, %v1652_v11, %v1637_v14 }
 0x594   : > { %2230 = vmatprep.mubr.msk.f32.mxu0 %vm399_vm0, %v1657_v20 }
 0x595   : > { %v1643_v1 = vpop.permute.xlu0 %1642  ;;  %2231 = vmatmul.mubr.msk.f32.vlgmr.msra.gmra.mrb[18].mxu0 %vm399_vm0, %v1658_v21 }
 0x596   : > { %v1641_v23 = vpop.permute.xlu1 %1640  ;;  %v1660_v25 = vsel %vm1656_vm4, %v1655_v17, %v1643_v1 }
 0x597   : > { %v1659_v12 = vsel %vm1656_vm4, %v1654_v22, %v1641_v23 }
 0x598   : > { %2233 = vmatprep.mubr.msk.f32.mxu0 %vm399_vm0, %v1659_v12 }
 0x599   : > { %2234 = vmatmul.mubr.msk.f32.gmra.mrb[20].mxu0 %vm399_vm0, %v1660_v25 }
 0x668   : > { %v2232_v28 = vpop.f32.mrb[18].mxu0 }
 0x669   : > { %v1756_v31 = vadd.f32 %v2232_v28, %v2030_v27  ;;  %v1750_v15 = vpop.f32.mrb[19].mxu0 }
 0x66a   : > { %v1751_v32 = vadd.f32 %v2030_v27, %v1750_v15 }
 0x66b   : > { %1770 = vst.msk [vmem:[%s383_s21 + $0x8] sm:$0xff] %vm399_vm0, %v1756_v31 }
 0x66c   : > { %1769 = vst.msk [vmem:[%s383_s21] sm:$0xff] %vm399_vm0, %v1751_v32  ;;  %v2235_v33 = vpop.f32.mrb[20].mxu0 }
 0x66d   : > { %v1766_v16 = vadd.f32 %v2235_v33, %v2030_v27  ;;  %v1760_v26 = vpop.f32.mrb[21].mxu0 }
 0x66e   : > { %2655 = shalt.err (!%p2652_p3)
}
 0x66f   : > { %s2656_s17 = scalar_lea.hbm %s3355_s23, 256  ;;  %s2660_s21 = scalar_lea.hbm %s3450_s6, 512 }
 0x670   : > { %p2657_p9 = scmp.ne.s32.totalorder %s3355_s23, %s2656_s17  ;;  %p2661_p7 = scmp.lt.u32.totalorder %s3355_s23, %s3450_s6 }
 0x671   : > { %p2662_p12 = scmp.lt.u32.totalorder %s2660_s21, %s2656_s17  ;;  %p2664_p2 = scmp.lt.u32.totalorder %s2656_s17, %s3355_s23 }
 0x672   : > { %p2658_p13 = pnand %p2657_p9, %p2965_p5 }
 0x673   : > { %p2663_p1 = por %p2662_p12, %p2661_p7 }
 0x674   : > { %p2659_p11 = pneg %p2658_p13 }
 0x675   : > { %p2665_p4 = por %p2664_p2, %p2663_p1 }
 0x677   : > { %p2666_p0 = pnand %p2665_p4, %p2659_p11 }
 0x679   : > { %2669 = shalt.err (!%p2666_p0)
}
 0x67a   : > { %s2769_s13 = smov 128   ;;  %v1761_v24 = vadd.f32 %v2030_v27, %v1760_v26  ;;  %s3393_s30 = scalar_lea.hbm %s3451_s7, %s2045_s14  ;;  %1772 = vst.msk [vmem:[%s3347_s0 + $0x8] sm:$0xff] %vm399_vm0, %v1766_v16 }
 0x67b   : > { %2318 = dma.vmem_to_hbm [thread:$0]  (%p2965_p5), %s3344_s3, 256, %s3355_s23, %s1774_s29, %s2769_s13, %s2769_s13, %s2765_s11  }
 0x67c   : > { %1771 = vst.msk [vmem:[%s3347_s0] sm:$0xff] %vm399_vm0, %v1761_v24  ;;  %s1779_s4 = scalar_lea.sflag [#allocation13], %s3057_s18  ;;  %s2670_s12 = scalar_lea.vmem %s3359_s8, 256 }
 0x67d   : > { %p2671_p8 = scmp.ne.s32.totalorder %s3359_s8, %s2670_s12  ;;  %s2770_s17 = smov [#allocation12]  }
 0x67e   : > { %s2674_s20 = sshll.u32 %s2770_s17, 4  ;;  %s2675_s20 = int_to_ptr.vmem [resolvable:$false] %s2674_s20 }
 0x67f   : > { %p2672_p6 = pnand %p2671_p8, %p2965_p5  ;;  %s2676_s3 = scalar_lea.vmem %s2675_s20, 512 }
 0x680   : > { %p2677_p3 = scmp.lt.s32.totalorder %s3359_s8, %s2675_s20  ;;  %p2678_p9 = scmp.lt.s32.totalorder %s2676_s3, %s2670_s12 }
 0x681   : > { %p2673_p10 = pneg %p2672_p6 }
 0x682   : > { %p2679_p13 = por %p2678_p9, %p2677_p3 }
 0x684   : > { %p2680_p11 = pnand %p2679_p13, %p2673_p10 }
 0x686   : > { %2683 = shalt.err (!%p2680_p11)
}
 0x687   : > { %s2684_s28 = scalar_lea.hbm %s3393_s30, 256  ;;  %s2688_s23 = scalar_lea.hbm %s3451_s7, 512 }
 0x688   : > { %p2685_p7 = scmp.ne.s32.totalorder %s3393_s30, %s2684_s28  ;;  %p2689_p2 = scmp.lt.u32.totalorder %s3393_s30, %s3451_s7 }
 0x689   : > { %p2690_p4 = scmp.lt.u32.totalorder %s2688_s23, %s2684_s28  ;;  %p2692_p8 = scmp.lt.u32.totalorder %s2684_s28, %s3393_s30 }
 0x68a   : > { %p2686_p12 = pnand %p2685_p7, %p2965_p5 }
 0x68b   : > { %p2691_p0 = por %p2690_p4, %p2689_p2 }
 0x68c   : > { %p2687_p1 = pneg %p2686_p12 }
 0x68d   : > { %p2693_p6 = por %p2692_p8, %p2691_p0 }
 0x68f   : > { %p2694_p10 = pnand %p2693_p6, %p2687_p1 }
 0x691   : > { %2697 = shalt.err (!%p2694_p10)
}
 0x692   : > { %2319 = dma.vmem_to_hbm [thread:$0]  (%p2965_p5), %s3359_s8, 256, %s3393_s30, %s1779_s4, %s2769_s13, %s2769_s13, %s2765_s11  }
 0x693 PF: > { %s3488_s21 = sld [smem:[#allocation20_spill]]  ;;  %s1823_s16 = sand.u32 1, %s2740_s24  }
 0x694   : > { %p3490_p9 = scmp.ge.s32.totalorder %s2752_s27, 2  ;;  %s1824_s10 = scalar_lea.sflag [#allocation4], %s1823_s16 }
 0x699   : > { %p3489_p3 = scmp.ne.s32.totalorder %s3488_s21, 0 }
 0x69b   : > { %p2340_p13 = pnand %p3490_p9, %p3489_p3 }
 0x69d   : > { %2731 = dma.done.wait (!%p2340_p13), %s1824_s10, 256  }
 0x69e   : > { %2733 = vsyncadd (!%p2340_p13), %s1824_s10, 4294967040  ;;  %s1833_s19 = scalar_lea.sflag [#allocation13], %s1823_s16 }
 0x69f   : > { %2735 = dma.done.wait (!%p2340_p13), %s1833_s19, 256  }
 0x6a0   : > { %2737 = vsyncadd (!%p2340_p13), %s1833_s19, 4294967040  ;;  %s3491_s18 = sld [smem:[#allocation21_spill]]  ;;  %p28_p5 = scmp.ge.s32.totalorder %s2951_s22, 4  }
 0x6a1   : > { %s3492_s24 = smov %s2744_s25  ;;  %s3493_s25 = smov %s2748_s26 }
 0x6a2   : > { %s3495_s27 = smov %s2951_s22  ;;  %30 = sbr.rel (!%p28_p5) target bundleno = 15 (0xf), region = 131 }
 0x6a6   : > { %s3494_s26 = smov %s3491_s18 }
 0x6a9   :  { %1838 = vsyncpa [#allocation3], 1 }
 0x6aa   :  { %1840 = vsyncpa [#allocation3 + $0x1], 1 }
 0x6ab   :  { %1841 = vsyncpa [#allocation6], 1 }
 0x6ac   :  { %1843 = vsyncpa [#allocation6 + $0x1], 1 }
 0x6ad   :  { %1844 = vsyncpa [#allocation9], 1 }
 0x6ae   :  { %1845 = vsyncpa [#allocation4], 1 }
 0x6af   :  { %1847 = vsyncpa [#allocation4 + $0x1], 1 }
 0x6b0   :  { %1848 = vsyncpa [#allocation13], 1 }
 0x6b1   :  { %1850 = vsyncpa [#allocation13 + $0x1], 1 }

</bundles_post_ra>
